<compile_context>
chip_gen: v7x
topology: tpu7x:2x2x1
jax: 0.10.0
libtpu: 0.0.40
codegen_flags: <defaults>
</compile_context>

<pallas_src>
import jax
import jax.numpy as jnp
from jax import lax
from jax.experimental import pallas as pl
from jax.experimental.pallas import tpu as pltpu


def _round_up(n, m):
    return (n + m - 1) // m * m


def _vmem_limit(in_bytes, out_bytes, tmp_bytes):
    # double-buffered inputs/outputs + live temporaries, 2x headroom,
    # clamped to stay well under v7x's 64 MiB physical VMEM.
    # TODO(synk): for hr in the multi-thousand range, re-tile adj@adj.T with a full
    # (i, j, k) accumulator grid instead of keeping the whole adj resident.
    need = 2 * (in_bytes + out_bytes) + tmp_bytes
    return int(min(max(2 * need, 4 << 20), 48 << 20))


# --------------------------------------------------------------------------
# Kernel 1: one row block of adj = | (a @ U.T) @ X |, diag <- 1
# --------------------------------------------------------------------------
def _adj_kernel(a_ref, u_ref, x_ref, adj_ref, adjb_ref):
    tm = a_ref.shape[0]                 # static row-block size
    hr_p = x_ref.shape[1]               # padded hr (multiple of 128)
    row0 = pl.program_id(0) * tm         # global row offset of this block

    # b = a @ U.T  — NT dot_general (no transpose materialized), bf16 operands,
    # f32 accumulation on the MXU.
    b = lax.dot_general(a_ref[...], u_ref[...], (((1,), (1,)), ((), ())),
                        preferred_element_type=jnp.float32)        # (tm, lr) f32
    f_d = lax.dot_general(b.astype(jnp.bfloat16), x_ref[...],
                          (((1,), (0,)), ((), ())),
                          preferred_element_type=jnp.float32)      # (tm, hr_p) f32
    f_d = jnp.abs(f_d)

    # Per-tile diagonal mask (only (tm, hr_p) iota planes, never (hr, hr)).
    r = lax.broadcasted_iota(jnp.int32, (tm, hr_p), 0) + row0
    c = lax.broadcasted_iota(jnp.int32, (tm, hr_p), 1)
    adj = jnp.where(r == c, 1.0, f_d)                              # fill_diagonal_(1)

    adj_ref[...] = adj                                             # f32 module output
    adjb_ref[...] = adj.astype(jnp.bfloat16)                       # bf16 operand for kernel 2


# --------------------------------------------------------------------------
# Kernel 2: one row block of out = | adj @ adj.T |, diag <- 1
# --------------------------------------------------------------------------
def _x_kernel(adj_row_ref, adj_full_ref, x_ref):
    tm = adj_row_ref.shape[0]
    hr_p = adj_full_ref.shape[0]
    row0 = pl.program_id(0) * tm

    # Row block of adj @ adj.T — NT dot_general, bf16 operands, f32 accumulate.
    x = lax.dot_general(adj_row_ref[...], adj_full_ref[...],
                        (((1,), (1,)), ((), ())),
                        preferred_element_type=jnp.float32)        # (tm, hr_p) f32
    # (X + X.T)/2 is a bit-exact no-op: x[i,j] and x[j,i] accumulate identical bf16
    # products over the same k order in a single MXU pass, so it is skipped.
    r = lax.broadcasted_iota(jnp.int32, (tm, hr_p), 0) + row0
    c = lax.broadcasted_iota(jnp.int32, (tm, hr_p), 1)
    x = jnp.where(r == c, 1.0, x)                                  # fill_diagonal_(1)
    x_ref[...] = jnp.abs(x)


# --------------------------------------------------------------------------
# Wrapper
# --------------------------------------------------------------------------
def gsr_forward(A, X, weights, *, block_rows=128):
    lr = A.shape[0]
    hr = weights.shape[0]
    assert hr == 2 * lr, "GSRLayer requires hr_dim == 2 * lr_dim"
    assert X.shape == (lr, hr)

    # TODO(synk): torch.linalg.eigh (iterative dense eigensolver) has no clean Pallas
    # equivalent; computed with jnp.linalg.eigh here, outside the kernels.
    _, U = jnp.linalg.eigh(A, UPLO='U')            # eigenvalues are unused by the module

    # a = weights @ cat(I, I, 0)  ==  sum of the two column halves (hoisted to XLA).
    a = weights[:, :lr] + weights[:, lr:]          # (hr, lr) f32

    # Pad hr to a lane-dense multiple of 128 (zero padding is exact for every
    # contraction below; the padded rows/cols are sliced off at the end).
    hr_p = _round_up(hr, 128)
    tm = min(block_rows, hr_p)
    assert hr_p % tm == 0 and tm % 16 == 0, "row block must be a multiple of 16 dividing padded hr"
    pad = hr_p - hr
    grid = (hr_p // tm,)

    # Pre-cast to bf16 in the wrapper so the HBM->VMEM DMA is half-width.
    a_b = jnp.pad(a, ((0, pad), (0, 0))).astype(jnp.bfloat16)      # (hr_p, lr)
    u_b = U.astype(jnp.bfloat16)                                   # (lr, lr)
    x_b = jnp.pad(X, ((0, 0), (0, pad))).astype(jnp.bfloat16)      # (lr, hr_p)

    # ---- call 1: adj = |(a @ U.T) @ X|, diag <- 1 --------------------------------
    adj_in_bytes = tm * lr * 2 + lr * lr * 2 + lr * hr_p * 2
    adj_out_bytes = tm * hr_p * 4 + tm * hr_p * 2
    adj_flops = 2 * hr_p * lr * lr + 2 * hr_p * lr * hr_p
    adj_bytes = (hr_p * lr + lr * lr + lr * hr_p) * 2 + hr_p * hr_p * (4 + 2)

    adj_f32, adj_bf16 = pl.pallas_call(
        _adj_kernel,
        out_shape=(jax.ShapeDtypeStruct((hr_p, hr_p), jnp.float32),
                   jax.ShapeDtypeStruct((hr_p, hr_p), jnp.bfloat16)),
        grid_spec=pltpu.PrefetchScalarGridSpec(
            num_scalar_prefetch=0, grid=grid,
            in_specs=[pl.BlockSpec((tm, lr), lambda i: (i, 0)),     # row block of a
                      pl.BlockSpec((lr, lr), lambda i: (0, 0)),     # U resident
                      pl.BlockSpec((lr, hr_p), lambda i: (0, 0))],  # X resident
            out_specs=(pl.BlockSpec((tm, hr_p), lambda i: (i, 0)),
                       pl.BlockSpec((tm, hr_p), lambda i: (i, 0)))),
        compiler_params=pltpu.CompilerParams(
            dimension_semantics=("parallel",),
            vmem_limit_bytes=_vmem_limit(adj_in_bytes, adj_out_bytes, 3 * tm * hr_p * 4)),
        cost_estimate=pl.CostEstimate(flops=int(adj_flops), transcendentals=0,
                                      bytes_accessed=int(adj_bytes)),
    )(a_b, u_b, x_b)

    # ---- call 2: out = |adj @ adj.T|, diag <- 1 -----------------------------------
    x_in_bytes = tm * hr_p * 2 + hr_p * hr_p * 2
    x_out_bytes = tm * hr_p * 4
    x_flops = 2 * hr_p * hr_p * hr_p
    x_bytes = 2 * hr_p * hr_p * 2 + hr_p * hr_p * 4

    x_out = pl.pallas_call(
        _x_kernel,
        out_shape=jax.ShapeDtypeStruct((hr_p, hr_p), jnp.float32),
        grid_spec=pltpu.PrefetchScalarGridSpec(
            num_scalar_prefetch=0, grid=grid,
            in_specs=[pl.BlockSpec((tm, hr_p), lambda i: (i, 0)),    # row block of adj
                      pl.BlockSpec((hr_p, hr_p), lambda i: (0, 0))], # full adj resident
            out_specs=pl.BlockSpec((tm, hr_p), lambda i: (i, 0))),
        compiler_params=pltpu.CompilerParams(
            dimension_semantics=("parallel",),
            vmem_limit_bytes=_vmem_limit(x_in_bytes, x_out_bytes, 2 * tm * hr_p * 4)),
        cost_estimate=pl.CostEstimate(flops=int(x_flops), transcendentals=0,
                                      bytes_accessed=int(x_bytes)),
    )(adj_bf16, adj_bf16)

    # Strip lane-density padding (plain XLA slice).
    return adj_f32[:hr, :hr], x_out[:hr, :hr]


# --------------------------------------------------------------------------
# Plain-JAX f32 reference mirroring GSRLayer.forward literally
# --------------------------------------------------------------------------
def _reference(A, X, weights):
    lr = A.shape[0]
    _, U = jnp.linalg.eigh(A, UPLO='U')
    eye = jnp.eye(lr, dtype=jnp.float32)
    s_d = jnp.concatenate([eye, eye], axis=0)
    a = weights @ s_d
    b = a @ U.T
    f_d = jnp.abs(b @ X)
    hr = f_d.shape[0]
    diag = jnp.eye(hr, dtype=bool)
    adj = jnp.where(diag, 1.0, f_d)
    x = adj @ adj.T
    x = (x + x.T) / 2
    x = jnp.where(diag, 1.0, x)
    return adj, jnp.abs(x)


if __name__ == "__main__":
    LR_DIM = 16
    HR_DIM = 2 * LR_DIM   # hr_dim must equal 2*lr_dim (weights @ cat(I, I, 0))

    key = jax.random.PRNGKey(0)
    ka, kf, kw = jax.random.split(key, 3)

    a_raw = jax.random.normal(ka, (LR_DIM, LR_DIM), jnp.float32)
    A = (a_raw + a_raw.T) / 2                                    # symmetric LR graph
    Xf = jax.random.normal(kf, (LR_DIM, HR_DIM), jnp.float32)    # node features
    init_range = (6.0 / (HR_DIM + HR_DIM)) ** 0.5                # glorot, as in module
    weights = jax.random.uniform(kw, (HR_DIM, HR_DIM), jnp.float32,
                                 -init_range, init_range)

    # block_rows=64 at this demo size gives a 2-step grid and exercises the
    # per-block diagonal-offset logic; production sizes use the default 128.
    adj, x_out = jax.block_until_ready(gsr_forward(A, Xf, weights, block_rows=64))
    adj_ref, x_ref = _reference(A, Xf, weights)

    assert adj.shape == (HR_DIM, HR_DIM), adj.shape
    assert x_out.shape == (HR_DIM, HR_DIM), x_out.shape
    # bf16 MXU operands (f32 accumulate) -> compare against f32 reference loosely.
    assert jnp.allclose(adj, adj_ref, rtol=5e-2, atol=5e-2), (adj, adj_ref)
    assert jnp.allclose(x_out, x_ref, rtol=5e-2, atol=5e-2), (x_out, x_ref)
    print("KERNEL_OK")
</pallas_src>

<mosaic_0001>
module attributes {stable_mosaic.version = 11 : i64} {
  func.func @_adj_kernel(%arg0: i32, %arg1: memref<64x16xbf16, #tpu.memory_space<vmem>>, %arg2: memref<16x16xbf16, #tpu.memory_space<vmem>>, %arg3: memref<16x128xbf16, #tpu.memory_space<vmem>>, %arg4: memref<64x128xf32, #tpu.memory_space<vmem>>, %arg5: memref<64x128xbf16, #tpu.memory_space<vmem>>) attributes {dimension_semantics = [#tpu.dimension_semantics<parallel>], iteration_bounds = array<i64: 2>, scalar_prefetch = 0 : i64, scratch_operands = 0 : i64, tpu.core_type = #tpu.core_type<tc>, window_params = [{transform_indices = @transform_0, window_bounds = array<i64: 64, 16>}, {pipeline_mode = #tpu.pipeline_mode<synchronous>, transform_indices = @transform_1, window_bounds = array<i64: 16, 16>}, {pipeline_mode = #tpu.pipeline_mode<synchronous>, transform_indices = @transform_2, window_bounds = array<i64: 16, 128>}, {transform_indices = @transform_3, window_bounds = array<i64: 64, 128>}, {transform_indices = @transform_4, window_bounds = array<i64: 64, 128>}]} {
    %c64_i32 = arith.constant 64 : i32
    %0 = arith.muli %arg0, %c64_i32 : i32
    %c0 = arith.constant 0 : index
    %c0_0 = arith.constant 0 : index
    %1 = vector.load %arg1[%c0, %c0_0] : memref<64x16xbf16, #tpu.memory_space<vmem>>, vector<64x16xbf16>
    %c0_1 = arith.constant 0 : index
    %c0_2 = arith.constant 0 : index
    %2 = vector.load %arg2[%c0_1, %c0_2] : memref<16x16xbf16, #tpu.memory_space<vmem>>, vector<16x16xbf16>
    %cst = arith.constant dense<0.000000e+00> : vector<64x16xf32>
    %3 = tpu.matmul %1, %2, %cst {dimension_numbers = #tpu.dot_dimension_numbers<[1], [1], [0], [0], [0, 0, 1, 0], [], []>} : vector<64x16xbf16>, vector<16x16xbf16>, vector<64x16xf32> -> vector<64x16xf32>
    %4 = arith.truncf %3 : vector<64x16xf32> to vector<64x16xbf16>
    %c0_3 = arith.constant 0 : index
    %c0_4 = arith.constant 0 : index
    %5 = vector.load %arg3[%c0_3, %c0_4] : memref<16x128xbf16, #tpu.memory_space<vmem>>, vector<16x128xbf16>
    %cst_5 = arith.constant dense<0.000000e+00> : vector<64x128xf32>
    %6 = tpu.matmul %4, %5, %cst_5 {dimension_numbers = #tpu.dot_dimension_numbers<[1], [0], [0], [1], [0, 0, 1, 1], [], []>} : vector<64x16xbf16>, vector<16x128xbf16>, vector<64x128xf32> -> vector<64x128xf32>
    %7 = math.absf %6 : vector<64x128xf32>
    %8 = tpu.iota {dimensions = array<i32: 0>} : vector<64x128xi32>
    %9 = vector.broadcast %0 : i32 to vector<64x128xi32>
    %10 = arith.addi %8, %9 : vector<64x128xi32>
    %11 = tpu.iota {dimensions = array<i32: 1>} : vector<64x128xi32>
    %12 = arith.cmpi eq, %10, %11 : vector<64x128xi32>
    %cst_6 = arith.constant 1.000000e+00 : f32
    %13 = vector.broadcast %cst_6 : f32 to vector<64x128xf32>
    %14 = arith.select %12, %13, %7 : vector<64x128xi1>, vector<64x128xf32>
    %c0_7 = arith.constant 0 : index
    %c0_8 = arith.constant 0 : index
    %15 = vector.load %arg4[%c0_7, %c0_8] : memref<64x128xf32, #tpu.memory_space<vmem>>, vector<64x128xf32>
    tpu.vector_store %arg4[%c0_7, %c0_8], %14 {strides = array<i32>} : memref<64x128xf32, #tpu.memory_space<vmem>>, vector<64x128xf32>,
    %16 = arith.truncf %14 : vector<64x128xf32> to vector<64x128xbf16>
    %c0_9 = arith.constant 0 : index
    %c0_10 = arith.constant 0 : index
    %17 = vector.load %arg5[%c0_9, %c0_10] : memref<64x128xbf16, #tpu.memory_space<vmem>>, vector<64x128xbf16>
    tpu.vector_store %arg5[%c0_9, %c0_10], %16 {strides = array<i32>} : memref<64x128xbf16, #tpu.memory_space<vmem>>, vector<64x128xbf16>,
    return
  }
  func.func @transform_0(%arg0: i32) -> (i32, i32) {
    %c0_i32 = arith.constant 0 : i32
    %c0_i32_0 = arith.constant 0 : i32
    return %arg0, %c0_i32 : i32, i32
  }
  func.func @transform_1(%arg0: i32) -> (i32, i32) {
    %c0_i32 = arith.constant 0 : i32
    %c0_i32_0 = arith.constant 0 : i32
    %c0_i32_1 = arith.constant 0 : i32
    return %c0_i32, %c0_i32_0 : i32, i32
  }
  func.func @transform_2(%arg0: i32) -> (i32, i32) {
    %c0_i32 = arith.constant 0 : i32
    %c0_i32_0 = arith.constant 0 : i32
    %c0_i32_1 = arith.constant 0 : i32
    return %c0_i32, %c0_i32_0 : i32, i32
  }
  func.func @transform_3(%arg0: i32) -> (i32, i32) {
    %c0_i32 = arith.constant 0 : i32
    %c0_i32_0 = arith.constant 0 : i32
    return %arg0, %c0_i32 : i32, i32
  }
  func.func @transform_4(%arg0: i32) -> (i32, i32) {
    %c0_i32 = arith.constant 0 : i32
    %c0_i32_0 = arith.constant 0 : i32
    return %arg0, %c0_i32 : i32, i32
  }
}

</mosaic_0001>

<bundles_post_ra>
// kernel: tpu_custom_call.1
= control target key start
LH: loop header
LB: loop body
LE: loop exit
PB: predicated region body
PF: predicated region fallthrough
CT: control target
= control target key end

     0   :  { %10 = vsyncpa [#allocation3], 0  ;;  %s1106_s0 = inlined_call_operand.vmem [shape: bf16[128,16], index: 0, kind: input, shape index: {}]   ;;  %s1107_s1 = inlined_call_operand.vmem [shape: bf16[16,16], index: 1, kind: input, shape index: {}]   ;;  %s1108_s2 = inlined_call_operand.vmem [shape: bf16[16,128], index: 2, kind: input, shape index: {}]   ;;  %s1109_s3 = inlined_call_operand.hbm [shape: f32[128,128], index: 3, kind: output, shape index: {0}]   ;;  %s1110_s4 = inlined_call_operand.hbm [shape: bf16[128,128], index: 4, kind: output, shape index: {1}]  }
   0x1   :  { %12 = vsyncpa [#allocation3 + $0x1], 0 }
   0x2   :  { %13 = vsyncpa [#allocation5], 0 }
   0x3   :  { %15 = vsyncpa [#allocation5 + $0x1], 0  ;;  %s923_s15 = smov 0   ;;  %s925_s16 = smov 0  }
   0x4   :  { %s927_s17 = smov 0   ;;  %s929_s18 = smov 0  }
   0x5 LB: > { %s944_s19 = sadd.s32 4294967295, %s890_s18   ;;  %s639_s20 = sadd.s32 4294967294, %s890_s18   ;;  %s890_s18 = sphi %s929_s18, %s1116_s18   ;;  %s886_s17 = sphi %s927_s17, %s1115_s17   ;;  %s882_s16 = sphi %s925_s16, %s1114_s16   ;;  %s878_s15 = sphi %s923_s15, %s1113_s15  }
   0x6   : > { %s948_s21 = sadd.s32 1, %s890_s18   ;;  %s96_s22 = sadd.s32 1, %s886_s17 }
   0x7   : > { %s93_s23 = ssub.s32 %s890_s18, %s948_s21  ;;  %p106_p0 = scmp.ne.s32.totalorder %s886_s17, %s882_s16 }
   0x8   : > { %p94_p1 = scmp.eq.s32.totalorder %s93_s23, 0  ;;  %p107_p2 = scmp.eq.s32.totalorder %s944_s19, 1 }
   0x9   : > { %p112_p3 = scmp.ne.s32.totalorder %s882_s16, %s878_s15  ;;  %p113_p4 = scmp.eq.s32.totalorder %s639_s20, 1 }
   0xa   : > { %s959_s24 = scalar_select %p94_p1, %s886_s17, %s96_s22  }
   0xb   : > { %p961_p5 = por %p107_p2, %p106_p0  ;;  %p965_p6 = por %p113_p4, %p112_p3 }
   0xc   : > { %p642_p7 = scmp.ge.s32.totalorder %s890_s18, 1  ;;  %p172_p8 = scmp.lt.s32.totalorder %s890_s18, 3 }
   0xe   : > { %p173_p9 = pnand %p642_p7, %p172_p8 }
   0xf   : > { %v790_v0 = vld [vmem:[%s1107_s1] sm:$0xff] (!%p173_p9)   ;;  %vm248_vm0 = vcmask (!%p173_p9), 130048   ;;  %s645_s29 = sshll.u32 (!%p173_p9), %s944_s19, 3  ;;  %v426_v19 = vlaneseq (!%p173_p9)  ;;  %s647_s10 = sshll.u32 (!%p173_p9), %s944_s19, 6 }
  0x10   : > { %176 = sbr.rel (%p173_p9) target bundleno = 512 (0x200), region = 32  ;;  %741 = vmatprep.subr.msk.bf16.mxu0 (!%p173_p9), %vm248_vm0, %v790_v0  ;;  %v262_v1 = vsel (!%p173_p9), %vm248_vm0, %v790_v0, 0  ;;  %p204_p10 = scmp.lt.s32.totalorder (!%p173_p9), %s645_s29, 15  ;;  %v795_v6 = vld [vmem:[%s1108_s2] sm:$0xff] (!%p173_p9)   ;;  %v435_v22 = vstv (!%p173_p9), %s647_s10 }
  0x11   : > { %722 = vmatpush3.bf16.xpose.msra.mxu0 (!%p173_p9), %v262_v1  ;;  %731 = vmatprep.subr.bf16.mxu1 (!%p173_p9), %v795_v6  ;;  %v427_v20 = vshrl.u32 (!%p173_p9), %v426_v19, 7  ;;  %s993_s11 = sand.u32 (!%p173_p9), 1, %s882_s16   ;;  %v995_v26 = vand.u32 (!%p173_p9), 127, %v426_v19  ;;  %s686_s23 = sshll.u32 (!%p173_p9), %s944_s19, 10 }
  0x12   : > { %732 = vmatpush3.bf16.msra.mxu1 (!%p173_p9), %v795_v6  ;;  %s643_s12 = sshll.u32 (!%p173_p9), %s993_s11, 6  ;;  %s644_s13 = sshll.u32 (!%p173_p9), %s993_s11, 5 }
  0x13   : > { %v429_v21 = vadd.s32 (!%p173_p9), 16, %v427_v20  ;;  %v430_v23 = vadd.s32 (!%p173_p9), 24, %v427_v20  ;;  %v428_v24 = vadd.s32 (!%p173_p9), 8, %v427_v20  ;;  %v436_v27 = vadd.s32 (!%p173_p9), %v435_v22, %v427_v20  ;;  %s1003_s14 = scalar_lea.vmem (!%p173_p9), [#allocation2], %s643_s12  ;;  %s1009_s20 = scalar_lea.vmem (!%p173_p9), [#allocation4], %s644_s13 }
  0x14   : > { %v433_v31 = vadd.s32 (!%p173_p9), 48, %v427_v20  ;;  %v431_v34 = vadd.s32 (!%p173_p9), 32, %v427_v20  ;;  %v434_v37 = vadd.s32 (!%p173_p9), 56, %v427_v20  ;;  %v432_v41 = vadd.s32 (!%p173_p9), 40, %v427_v20  ;;  %s545_s22 = sshll.u32 (!%p173_p9), %s1009_s20, 4  ;;  %s529_s27 = sshll.u32 (!%p173_p9), %s1003_s14, 4  ;;  %s1019_s22 = int_to_ptr.vmem [resolvable:$true] %s545_s22  ;;  %s1029_s27 = int_to_ptr.vmem [resolvable:$true] %s529_s27 }
  0x15   : > { %v438_v25 = vadd.s32 (!%p173_p9), %v435_v22, %v429_v21  ;;  %v439_v28 = vadd.s32 (!%p173_p9), %v435_v22, %v430_v23  ;;  %v437_v29 = vadd.s32 (!%p173_p9), %v435_v22, %v428_v24  ;;  %vm446_vm2 = vcmp.eq.s32.totalorder (!%p173_p9), %v436_v27, %v995_v26  ;;  %s687_s28 = sshll.u32 (!%p173_p9), %s944_s19, 9  ;;  %s1027_s5 = scalar_lea.hbm (!%p173_p9), %s1109_s3, %s686_s23 }
  0x16   : > { %v442_v44 = vadd.s32 (!%p173_p9), %v435_v22, %v433_v31  ;;  %v440_v46 = vadd.s32 (!%p173_p9), %v435_v22, %v431_v34  ;;  %v443_v49 = vadd.s32 (!%p173_p9), %v435_v22, %v434_v37  ;;  %v441_v51 = vadd.s32 (!%p173_p9), %v435_v22, %v432_v41  ;;  %s511_s8 = scalar_lea.sflag (!%p173_p9), [#allocation3], %s993_s11  ;;  %s796_s9 = scalar_lea.vmem (!%p173_p9), %s1029_s27, 1024 }
  0x17   : > { %s1118_s29 = smov (!%p204_p10, %s645_s29), 15  ;;  %vm448_vm1 = vcmp.eq.s32.totalorder %v438_v25, %v995_v26  ;;  %vm449_vm3 = vcmp.eq.s32.totalorder %v439_v28, %v995_v26  ;;  %vm447_vm4 = vcmp.eq.s32.totalorder %v437_v29, %v995_v26  ;;  %p797_p11 = scmp.ne.s32.totalorder %s1029_s27, %s796_s9 }
  0x18   : > { %s646_s30 = sshll.u32 %s1118_s29, 2  ;;  %vm452_vm5 = vcmp.eq.s32.totalorder %v442_v44, %v995_v26  ;;  %vm450_vm6 = vcmp.eq.s32.totalorder %v440_v46, %v995_v26  ;;  %vm453_vm7 = vcmp.eq.s32.totalorder %v443_v49, %v995_v26  ;;  %vm451_vm8 = vcmp.eq.s32.totalorder %v441_v51, %v995_v26  ;;  %s892_s10 = smov [#allocation2]  }
  0x19   : > { %s207_s7 = scalar_lea.vmem %s1106_s0, %s646_s30  ;;  %p798_p12 = pnand %p797_p11, %p961_p5 }
  0x1a   : > { %v791_v2 = vld [vmem:[%s207_s7] sm:$0xff]   ;;  %v792_v3 = vld [vmem:[%s207_s7 + $0x8] sm:$0xff]   ;;  %v793_v4 = vld [vmem:[%s207_s7 + $0x10] sm:$0xff]   ;;  %s800_s12 = sshll.u32 %s892_s10, 4  ;;  %s801_s12 = int_to_ptr.vmem [resolvable:$false] %s800_s12 }
  0x1b   : > { %723 = vmatprep.mubr.msk.bf16.mxu0 %vm248_vm0, %v791_v2  ;;  %v794_v5 = vld [vmem:[%s207_s7 + $0x18] sm:$0xff]   ;;  %s1036_s7 = scalar_lea.hbm %s1110_s4, %s687_s28  ;;  %p799_p13 = pneg %p798_p12 }
  0x1c   : > { %724 = vmatmul.mubr.msk.bf16.vlgmr.msra.gmra.mrb[0].mxu0 %vm248_vm0, %v792_v3  ;;  %s802_s13 = scalar_lea.vmem %s801_s12, 2048  ;;  %p803_p0 = scmp.lt.s32.totalorder %s1029_s27, %s801_s12 }
  0x1d   : > { %727 = vmatprep.mubr.msk.bf16.mxu0 %vm248_vm0, %v793_v4  ;;  %p804_p1 = scmp.lt.s32.totalorder %s802_s13, %s796_s9 }
  0x1f   : > { %p805_p2 = por %p804_p1, %p803_p0 }
  0x21   : > { %p806_p3 = pnand %p805_p2, %p799_p13 }
  0x24   : > { %728 = vmatmul.mubr.msk.bf16.gmra.mrb[4].mxu0 %vm248_vm0, %v794_v5 }
  0xef   : > { %v725_v7 = vpop.f32.mrb[0].mxu0 }
  0xf0   : > { %v298_v8 = vpop.f32.mrb[1].mxu0 }
  0xf1   : > { %v726_v9 = vpop.f32.mrb[2].mxu0 }
  0xf2   : > { %v330_v10 = vpack.c.bf16 %v726_v9, %v725_v7  ;;  %v301_v11 = vpop.f32.mrb[3].mxu0 }
  0xf3   : > { %v329_v12 = vpack.c.bf16 %v301_v11, %v298_v8 }
  0xf5   : > { %733 = vmatprep.mubr.msk.bf16.mxu1 %vm248_vm0, %v329_v12 }
  0xf6   : > { %734 = vmatmul.mubr.msk.bf16.vlgmr.msra.gmra.mrb[0].mxu1 %vm248_vm0, %v330_v10 }
  0xf7   : > { %v729_v13 = vpop.f32.mrb[4].mxu0 }
  0xf8   : > { %v314_v14 = vpop.f32.mrb[5].mxu0 }
  0xf9   : > { %v730_v15 = vpop.f32.mrb[6].mxu0 }
  0xfa   : > { %v332_v16 = vpack.c.bf16 %v730_v15, %v729_v13  ;;  %v317_v17 = vpop.f32.mrb[7].mxu0 }
  0xfb   : > { %v331_v18 = vpack.c.bf16 %v317_v17, %v314_v14 }
  0xfd   : > { %737 = vmatprep.mubr.msk.bf16.mxu1 %vm248_vm0, %v331_v18 }
  0xfe   : > { %738 = vmatmul.mubr.msk.bf16.gmra.mrb[4].mxu1 %vm248_vm0, %v332_v16 }
 0x1c9   : > { %v735_v30 = vpop.f32.mrb[0].mxu1 }
 0x1ca   : > { %v420_v32 = vand.u32 2147483647, %v735_v30  ;;  %v387_v33 = vpop.f32.mrb[1].mxu1 }
 0x1cb   : > { %v418_v35 = vand.u32 2147483647, %v387_v33  ;;  %v736_v36 = vpop.f32.mrb[2].mxu1 }
 0x1cc   : > { %v456_v38 = vsel %vm448_vm1, 1.0, %v420_v32  ;;  %v421_v39 = vand.u32 2147483647, %v736_v36  ;;  %v390_v40 = vpop.f32.mrb[3].mxu1 }
 0x1cd   : > { %464 = vst [vmem:[%s1003_s14 + $0x10] sm:$0xff] %v456_v38  ;;  %v454_v42 = vsel %vm446_vm2, 1.0, %v418_v35  ;;  %v419_v43 = vand.u32 2147483647, %v390_v40 }
 0x1ce   : > { %462 = vst [vmem:[%s1003_s14] sm:$0xff] %v454_v42  ;;  %v457_v45 = vsel %vm449_vm3, 1.0, %v421_v39 }
 0x1cf   : > { %465 = vst [vmem:[%s1003_s14 + $0x18] sm:$0xff] %v457_v45  ;;  %v696_v47 = vpack.c.bf16 %v457_v45, %v456_v38  ;;  %v455_v48 = vsel %vm447_vm4, 1.0, %v419_v43 }
 0x1d0   : > { %463 = vst [vmem:[%s1003_s14 + $0x8] sm:$0xff] %v455_v48  ;;  %v691_v50 = vpack.c.bf16 %v455_v48, %v454_v42 }
 0x1d1   : > { %708 = vst [vmem:[%s1009_s20 + $0x8] sm:$0xff] %v696_v47   ;;  %v739_v52 = vpop.f32.mrb[4].mxu1 }
 0x1d2   : > { %692 = vst [vmem:[%s1009_s20] sm:$0xff] %v691_v50   ;;  %v424_v53 = vand.u32 2147483647, %v739_v52  ;;  %v403_v54 = vpop.f32.mrb[5].mxu1 }
 0x1d3   : > { %v422_v55 = vand.u32 2147483647, %v403_v54  ;;  %v740_v56 = vpop.f32.mrb[6].mxu1 }
 0x1d4   : > { %v460_v57 = vsel %vm452_vm5, 1.0, %v424_v53  ;;  %v425_v58 = vand.u32 2147483647, %v740_v56  ;;  %v406_v59 = vpop.f32.mrb[7].mxu1 }
 0x1d5   : > { %468 = vst [vmem:[%s1003_s14 + $0x30] sm:$0xff] %v460_v57  ;;  %v458_v60 = vsel %vm450_vm6, 1.0, %v422_v55  ;;  %v423_v61 = vand.u32 2147483647, %v406_v59 }
 0x1d6   : > { %466 = vst [vmem:[%s1003_s14 + $0x20] sm:$0xff] %v458_v60  ;;  %v461_v62 = vsel %vm453_vm7, 1.0, %v425_v58 }
 0x1d7   : > { %469 = vst [vmem:[%s1003_s14 + $0x38] sm:$0xff] %v461_v62  ;;  %v706_v63 = vpack.c.bf16 %v461_v62, %v460_v57  ;;  %v459_v0 = vsel %vm451_vm8, 1.0, %v423_v61 }
 0x1d8   : > { %467 = vst [vmem:[%s1003_s14 + $0x28] sm:$0xff] %v459_v0  ;;  %v701_v1 = vpack.c.bf16 %v459_v0, %v458_v60 }
 0x1d9   : > { %710 = vst [vmem:[%s1009_s20 + $0x18] sm:$0xff] %v706_v63  }
 0x1da   : > { %809 = shalt.err (!%p806_p3)
}
 0x1db   : > { %s810_s14 = scalar_lea.hbm %s1027_s5, 1024  ;;  %s814_s29 = scalar_lea.hbm %s1109_s3, 2048 }
 0x1dc   : > { %p811_p4 = scmp.ne.s32.totalorder %s1027_s5, %s810_s14  ;;  %p815_p9 = scmp.lt.u32.totalorder %s1027_s5, %s1109_s3 }
 0x1dd   : > { %p816_p10 = scmp.lt.u32.totalorder %s814_s29, %s810_s14  ;;  %p818_p12 = scmp.lt.u32.totalorder %s810_s14, %s1027_s5 }
 0x1de   : > { %p812_p7 = pnand %p811_p4, %p961_p5 }
 0x1df   : > { %p817_p11 = por %p816_p10, %p815_p9 }
 0x1e0   : > { %p813_p8 = pneg %p812_p7 }
 0x1e1   : > { %p819_p13 = por %p818_p12, %p817_p11 }
 0x1e3   : > { %p820_p0 = pnand %p819_p13, %p813_p8 }
 0x1e5   : > { %823 = shalt.err (!%p820_p0)
}
 0x1e6   : > { %s893_s6 = smov 128   ;;  %s894_s9 = smov 8   ;;  %709 = vst [vmem:[%s1009_s20 + $0x10] sm:$0xff] %v701_v1  }
 0x1e7   : > { %742 = dma.vmem_to_hbm [thread:$0]  (%p961_p5), %s1029_s27, 1024, %s1027_s5, %s511_s8, %s893_s6, %s893_s6, %s894_s9  }
 0x1e8   : > { %s516_s10 = scalar_lea.sflag [#allocation5], %s993_s11  ;;  %s824_s12 = scalar_lea.vmem %s1019_s22, 512 }
 0x1e9   : > { %p825_p1 = scmp.ne.s32.totalorder %s1019_s22, %s824_s12  ;;  %s895_s13 = smov [#allocation4]  }
 0x1ea   : > { %s828_s14 = sshll.u32 %s895_s13, 4  ;;  %s829_s14 = int_to_ptr.vmem [resolvable:$false] %s828_s14 }
 0x1eb   : > { %p826_p2 = pnand %p825_p1, %p961_p5  ;;  %s830_s23 = scalar_lea.vmem %s829_s14, 1024 }
 0x1ec   : > { %p831_p4 = scmp.lt.s32.totalorder %s1019_s22, %s829_s14  ;;  %p832_p7 = scmp.lt.s32.totalorder %s830_s23, %s824_s12 }
 0x1ed   : > { %p827_p3 = pneg %p826_p2 }
 0x1ee   : > { %p833_p8 = por %p832_p7, %p831_p4 }
 0x1f0   : > { %p834_p9 = pnand %p833_p8, %p827_p3 }
 0x1f2   : > { %837 = shalt.err (!%p834_p9)
}
 0x1f3   : > { %s838_s20 = scalar_lea.hbm %s1036_s7, 512  ;;  %s842_s8 = scalar_lea.hbm %s1110_s4, 1024 }
 0x1f4   : > { %p839_p10 = scmp.ne.s32.totalorder %s1036_s7, %s838_s20  ;;  %p843_p13 = scmp.lt.u32.totalorder %s1036_s7, %s1110_s4 }
 0x1f5   : > { %p844_p0 = scmp.lt.u32.totalorder %s842_s8, %s838_s20  ;;  %p846_p2 = scmp.lt.u32.totalorder %s838_s20, %s1036_s7 }
 0x1f6   : > { %p840_p11 = pnand %p839_p10, %p961_p5 }
 0x1f7   : > { %p845_p1 = por %p844_p0, %p843_p13 }
 0x1f8   : > { %p841_p12 = pneg %p840_p11 }
 0x1f9   : > { %p847_p3 = por %p846_p2, %p845_p1 }
 0x1fb   : > { %p848_p4 = pnand %p847_p3, %p841_p12 }
 0x1fd   : > { %851 = shalt.err (!%p848_p4)
}
 0x1fe   : > { %s896_s30 = smov 64   ;;  %s897_s19 = smov 4  }
 0x1ff   : > { %743 = dma.vmem_to_hbm [thread:$0]  (%p961_p5), %s1019_s22, 512, %s1036_s7, %s516_s10, %s896_s30, %s896_s30, %s897_s19  }
 0x200 PF: > { %p753_p7 = scmp.ge.s32.totalorder %s890_s18, 2  ;;  %s560_s6 = sand.u32 1, %s878_s15  }
 0x201   : > { %s561_s9 = scalar_lea.sflag [#allocation3], %s560_s6 }
 0x202   : > { %p747_p8 = pnand %p753_p7, %p965_p6 }
 0x204   : > { %869 = dma.done.wait (!%p747_p8), %s561_s9, 1024  }
 0x205   : > { %871 = vsyncadd (!%p747_p8), %s561_s9, 4294966272  ;;  %s570_s12 = scalar_lea.sflag [#allocation5], %s560_s6 }
 0x206   : > { %873 = dma.done.wait (!%p747_p8), %s570_s12, 512  }
 0x207   : > { %875 = vsyncadd (!%p747_p8), %s570_s12, 4294966784  ;;  %p18_p5 = scmp.ge.s32.totalorder %s948_s21, 4   ;;  %s1113_s15 = smov %s882_s16 }
 0x208   : > { %s1114_s16 = smov %s886_s17  ;;  %s1115_s17 = smov %s959_s24 }
 0x209   : > { %s1116_s18 = smov %s948_s21  ;;  %20 = sbr.rel (!%p18_p5) target bundleno = 5 (0x5), region = 84 }
 0x210   :  { %575 = vsyncpa [#allocation3], 1 }
 0x211   :  { %577 = vsyncpa [#allocation3 + $0x1], 1 }
 0x212   :  { %578 = vsyncpa [#allocation5], 1 }
 0x213   :  { %580 = vsyncpa [#allocation5 + $0x1], 1 }

</bundles_post_ra>
